<compile_context>
chip_gen: v7x
topology: tpu7x:2x2x1
jax: 0.10.0
libtpu: 0.0.40
codegen_flags: <defaults>
</compile_context>

<pallas_src>
import jax
import jax.numpy as jnp
from jax.experimental import pallas as pl
from jax.experimental.pallas import tpu as pltpu


_INV_SQRT2 = 0.7071067811865476


def _round_up(x, m):
    return (x + m - 1) // m * m


def _pick_row_block(m, target=512):
    """Largest row tile <= target that is a multiple of 8 and divides m."""
    if m <= target:
        return m
    for tm in range(target - target % 8, 7, -8):
        if m % tm == 0:
            return tm
    return m  # fallback: single full-array block (always a legal BlockSpec)


def _conv_stats_kernel(p_ref, w_ref, y_ref, stats_ref):
    """Per-tile: conv as an MXU matmul + partial BatchNorm statistics.

    p_ref:     (TM, K)      im2col patch rows for this tile (K = 9*Cin)
    w_ref:     (K, Cpad)    conv weight, Cout zero-padded to Cpad (lane dense)
    y_ref:     (TM, Cpad)   conv output tile (pre-BN), f32
    stats_ref: (1, 2, Cpad) this tile's [sum, sum-of-squares] over its TM rows
    """
    y = jnp.dot(p_ref[...], w_ref[...], preferred_element_type=jnp.float32)
    y_ref[...] = y
    s = jnp.sum(y, axis=0, keepdims=True)            # (1, Cpad)
    ss = jnp.sum(y * y, axis=0, keepdims=True)       # (1, Cpad)
    stats_ref[...] = jnp.concatenate([s, ss], axis=0)[None]


def _bn_gelu_kernel(y_ref, scale_ref, shift_ref, o_ref):
    """Per-tile: y * scale + shift followed by exact (erf) GELU."""
    z = y_ref[...] * scale_ref[...] + shift_ref[...]
    o_ref[...] = 0.5 * z * (1.0 + jax.lax.erf(z * jnp.float32(_INV_SQRT2)))


def conv3x3s2_bn_gelu(x_nhwc, w, gamma, beta, *, eps=1e-5):
    """One Stem stage: 3x3/s2/p1 conv (no bias) + BatchNorm(batch stats) + GELU.

    x_nhwc: (N, H, W, Cin) f32;  w: (3, 3, Cin, Cout);  gamma/beta: (Cout,)
    returns (N, ceil(H/2), ceil(W/2), Cout) f32.
    """
    n, h, wdt, cin = x_nhwc.shape
    cout = w.shape[-1]
    assert w.shape == (3, 3, cin, cout)
    ho, wo = (h + 1) // 2, (wdt + 1) // 2            # Conv2d(3, stride=2, pad=1)

    # ---- glue: im2col via simple strided slices (no big transpose). -----------
    # NOTE: kept in f32 so the toy check matches an f32 reference at 1e-4; a
    # production bandwidth-bound stem would DMA these patches as bf16.
    xp = jnp.pad(x_nhwc, ((0, 0), (1, 1), (1, 1), (0, 0)))
    taps = [xp[:, kh:kh + 2 * ho:2, kw:kw + 2 * wo:2, :]
            for kh in range(3) for kw in range(3)]
    patches = jnp.concatenate(taps, axis=-1).reshape(n * ho * wo, 9 * cin)
    patches = patches.astype(jnp.float32)

    m, k = patches.shape
    cpad = _round_up(cout, 128)                      # lane-dense output channels
    tm = _pick_row_block(m)
    grid = m // tm

    w_pad = jnp.pad(w.reshape(k, cout).astype(jnp.float32),
                    ((0, 0), (0, cpad - cout)))

    # ---- pass 1: conv (MXU matmul) + per-tile partial statistics. -------------
    y_flat, part = pl.pallas_call(
        _conv_stats_kernel,
        out_shape=(jax.ShapeDtypeStruct((m, cpad), jnp.float32),
                   jax.ShapeDtypeStruct((grid, 2, cpad), jnp.float32)),
        grid=(grid,),
        in_specs=[
            pl.BlockSpec((tm, k), lambda i: (i, 0)),
            pl.BlockSpec((k, cpad), lambda i: (0, 0)),
        ],
        out_specs=(
            pl.BlockSpec((tm, cpad), lambda i: (i, 0)),
            pl.BlockSpec((1, 2, cpad), lambda i: (i, 0, 0)),
        ),
        compiler_params=pltpu.CompilerParams(
            dimension_semantics=("parallel",),
            vmem_limit_bytes=32 * 1024 * 1024),
    )(patches, w_pad)

    # ---- glue: finalize the whole-batch per-channel statistics (tiny). --------
    tot = jnp.sum(part, axis=0)                      # (2, cpad)
    mean = tot[0] / m
    var = jnp.maximum(tot[1] / m - mean * mean, 0.0)  # biased batch variance
    gamma_pad = jnp.pad(gamma.astype(jnp.float32), (0, cpad - cout))
    beta_pad = jnp.pad(beta.astype(jnp.float32), (0, cpad - cout))
    scale = gamma_pad * jax.lax.rsqrt(var + eps)
    shift = beta_pad - mean * scale

    # ---- pass 2: BN-apply + exact GELU (lane-dense, elementwise). -------------
    out_flat = pl.pallas_call(
        _bn_gelu_kernel,
        out_shape=jax.ShapeDtypeStruct((m, cpad), jnp.float32),
        grid=(grid,),
        in_specs=[
            pl.BlockSpec((tm, cpad), lambda i: (i, 0)),
            pl.BlockSpec((1, cpad), lambda i: (0, 0)),
            pl.BlockSpec((1, cpad), lambda i: (0, 0)),
        ],
        out_specs=pl.BlockSpec((tm, cpad), lambda i: (i, 0)),
        compiler_params=pltpu.CompilerParams(
            dimension_semantics=("parallel",),
            vmem_limit_bytes=32 * 1024 * 1024),
    )(y_flat, scale.reshape(1, cpad), shift.reshape(1, cpad))

    return out_flat[:, :cout].reshape(n, ho, wo, cout)


def stem_forward(x_nchw, params, *, eps=1e-5):
    """Pallas version of Stem.forward (two stages, each = 2 tiled kernels)."""
    x = jnp.transpose(x_nchw, (0, 2, 3, 1))          # NCHW -> NHWC
    y = conv3x3s2_bn_gelu(x, params["w1"], params["g1"], params["b1"], eps=eps)
    y = conv3x3s2_bn_gelu(y, params["w2"], params["g2"], params["b2"], eps=eps)
    return jnp.transpose(y, (0, 3, 1, 2))            # NHWC -> NCHW


def stem_reference(x_nchw, params, *, eps=1e-5):
    """Pure-JAX (XLA) reference mirroring the PyTorch forward pass."""
    def block(x, w, g, b):
        w_oihw = jnp.transpose(w, (3, 2, 0, 1))
        y = jax.lax.conv_general_dilated(
            x, w_oihw, window_strides=(2, 2), padding=((1, 1), (1, 1)),
            dimension_numbers=("NCHW", "OIHW", "NCHW"))
        mean = jnp.mean(y, axis=(0, 2, 3), keepdims=True)
        var = jnp.mean((y - mean) ** 2, axis=(0, 2, 3), keepdims=True)
        y = (y - mean) * jax.lax.rsqrt(var + eps)
        y = y * g.reshape(1, -1, 1, 1) + b.reshape(1, -1, 1, 1)
        return jax.nn.gelu(y, approximate=False)

    y = block(x_nchw, params["w1"], params["g1"], params["b1"])
    y = block(y, params["w2"], params["g2"], params["b2"])
    return y


def init_params(key, in_channels, out_channels):
    # Deterministic synthetic parameters (shapes per Stem.__init__).
    mid = out_channels // 2
    k1, k2 = jax.random.split(key)
    # Conv weights stored as (KH, KW, Cin, Cout) (PyTorch uses (Cout, Cin, KH, KW)).
    w1 = jax.random.normal(k1, (3, 3, in_channels, mid), jnp.float32) * 0.2
    w2 = jax.random.normal(k2, (3, 3, mid, out_channels), jnp.float32) * 0.1
    g1 = 1.0 + 0.05 * jnp.arange(mid, dtype=jnp.float32)
    b1 = 0.02 * jnp.arange(mid, dtype=jnp.float32) - 0.1
    g2 = 1.0 + 0.03 * jnp.arange(out_channels, dtype=jnp.float32)
    b2 = 0.01 * jnp.arange(out_channels, dtype=jnp.float32) - 0.05
    # TODO(synk): BatchNorm running-stat buffer updates (a training-time side
    # effect) are not materialized; only the forward output is produced.
    return {"w1": w1, "g1": g1, "b1": b1, "w2": w2, "g2": g2, "b2": b2}


if __name__ == "__main__":
    key = jax.random.PRNGKey(0)
    kx, kp = jax.random.split(key)
    in_channels, out_channels = 4, 32
    x = jax.random.normal(kx, (2, in_channels, 16, 16), jnp.float32)  # NCHW

    params = init_params(kp, in_channels, out_channels)

    out = jax.block_until_ready(stem_forward(x, params))
    ref = jax.block_until_ready(stem_reference(x, params))

    assert out.shape == (2, out_channels, 4, 4), out.shape
    assert jnp.allclose(out, ref, atol=1e-4, rtol=1e-4), float(
        jnp.max(jnp.abs(out - ref)))
    print("KERNEL_OK")
</pallas_src>

<mosaic_0001>
module attributes {stable_mosaic.version = 11 : i64} {
  func.func @_conv_stats_kernel(%arg0: i32, %arg1: memref<128x36xf32, #tpu.memory_space<vmem>>, %arg2: memref<36x128xf32, #tpu.memory_space<vmem>>, %arg3: memref<128x128xf32, #tpu.memory_space<vmem>>, %arg4: memref<1x2x128xf32, #tpu.memory_space<vmem>>) attributes {dimension_semantics = [#tpu.dimension_semantics<parallel>], iteration_bounds = array<i64: 1>, scalar_prefetch = 0 : i64, scratch_operands = 0 : i64, tpu.core_type = #tpu.core_type<tc>, window_params = [{transform_indices = @transform_0, window_bounds = array<i64: 128, 36>}, {pipeline_mode = #tpu.pipeline_mode<synchronous>, transform_indices = @transform_1, window_bounds = array<i64: 36, 128>}, {transform_indices = @transform_2, window_bounds = array<i64: 128, 128>}, {transform_indices = @transform_3, window_bounds = array<i64: 1, 2, 128>}]} {
    %c0 = arith.constant 0 : index
    %c0_0 = arith.constant 0 : index
    %0 = vector.load %arg1[%c0, %c0_0] : memref<128x36xf32, #tpu.memory_space<vmem>>, vector<128x36xf32>
    %c0_1 = arith.constant 0 : index
    %c0_2 = arith.constant 0 : index
    %1 = vector.load %arg2[%c0_1, %c0_2] : memref<36x128xf32, #tpu.memory_space<vmem>>, vector<36x128xf32>
    %cst = arith.constant dense<0.000000e+00> : vector<128x128xf32>
    %2 = tpu.matmul %0, %1, %cst {dimension_numbers = #tpu.dot_dimension_numbers<[1], [0], [0], [1], [0, 0, 1, 1], [], []>} : vector<128x36xf32>, vector<36x128xf32>, vector<128x128xf32> -> vector<128x128xf32>
    %c0_3 = arith.constant 0 : index
    %c0_4 = arith.constant 0 : index
    %3 = vector.load %arg3[%c0_3, %c0_4] : memref<128x128xf32, #tpu.memory_space<vmem>>, vector<128x128xf32>
    tpu.vector_store %arg3[%c0_3, %c0_4], %2 {strides = array<i32>} : memref<128x128xf32, #tpu.memory_space<vmem>>, vector<128x128xf32>,
    %cst_5 = arith.constant dense<0.000000e+00> : vector<128xf32>
    %4 = vector.multi_reduction <add>, %2, %cst_5 [0] : vector<128x128xf32> to vector<128xf32>
    %5 = vector.shape_cast %4 : vector<128xf32> to vector<1x128xf32>
    %6 = arith.mulf %2, %2 : vector<128x128xf32>
    %cst_6 = arith.constant dense<0.000000e+00> : vector<128xf32>
    %7 = vector.multi_reduction <add>, %6, %cst_6 [0] : vector<128x128xf32> to vector<128xf32>
    %8 = vector.shape_cast %7 : vector<128xf32> to vector<1x128xf32>
    %9 = tpu.concatenate %5, %8 in 0 : vector<1x128xf32>, vector<1x128xf32> -> vector<2x128xf32>
    %10 = vector.shape_cast %9 : vector<2x128xf32> to vector<1x2x128xf32>
    %c0_7 = arith.constant 0 : index
    %c0_8 = arith.constant 0 : index
    %c0_9 = arith.constant 0 : index
    %11 = vector.load %arg4[%c0_7, %c0_8, %c0_9] : memref<1x2x128xf32, #tpu.memory_space<vmem>>, vector<1x2x128xf32>
    tpu.vector_store %arg4[%c0_7, %c0_8, %c0_9], %10 {strides = array<i32>} : memref<1x2x128xf32, #tpu.memory_space<vmem>>, vector<1x2x128xf32>,
    return
  }
  func.func @transform_0(%arg0: i32) -> (i32, i32) {
    %c0_i32 = arith.constant 0 : i32
    %c0_i32_0 = arith.constant 0 : i32
    return %arg0, %c0_i32 : i32, i32
  }
  func.func @transform_1(%arg0: i32) -> (i32, i32) {
    %c0_i32 = arith.constant 0 : i32
    %c0_i32_0 = arith.constant 0 : i32
    %c0_i32_1 = arith.constant 0 : i32
    return %c0_i32, %c0_i32_0 : i32, i32
  }
  func.func @transform_2(%arg0: i32) -> (i32, i32) {
    %c0_i32 = arith.constant 0 : i32
    %c0_i32_0 = arith.constant 0 : i32
    return %arg0, %c0_i32 : i32, i32
  }
  func.func @transform_3(%arg0: i32) -> (i32, i32, i32) {
    %c0_i32 = arith.constant 0 : i32
    %c0_i32_0 = arith.constant 0 : i32
    %c0_i32_1 = arith.constant 0 : i32
    return %arg0, %c0_i32, %c0_i32_0 : i32, i32, i32
  }
}

</mosaic_0001>

<bundles_post_ra>
// kernel: tpu_custom_call.1
= control target key start
LH: loop header
LB: loop body
LE: loop exit
PB: predicated region body
PF: predicated region fallthrough
CT: control target
= control target key end

     0   :  { %9 = vsyncpa [#allocation3], 0  ;;  %vm36_vm0 = vcmask 293888   ;;  %vm85_vm1 = vcmask 1043456   ;;  %s624_s0 = inlined_call_operand.vmem [shape: f32[128,36], index: 0, kind: input, shape index: {}]   ;;  %s625_s1 = inlined_call_operand.vmem [shape: f32[36,128], index: 1, kind: input, shape index: {}]   ;;  %s626_s2 = inlined_call_operand.hbm [shape: f32[128,128], index: 2, kind: output, shape index: {0}]   ;;  %s627_s3 = inlined_call_operand.hbm [shape: f32[1,2,128], index: 3, kind: output, shape index: {1}]  }
   0x1   :  { %v31_v0 = vld [vmem:[%s625_s1] sm:$0xff]  ;;  %v32_v1 = vld [vmem:[%s625_s1 + $0x8] sm:$0xff]  ;;  %v33_v2 = vld [vmem:[%s625_s1 + $0x10] sm:$0xff] }
   0x2   :  { %v413_v3 = vpack.c.bf16 %v32_v1, %v31_v0  ;;  %v34_v4 = vld [vmem:[%s625_s1 + $0x18] sm:$0xff]  ;;  %v15_v5 = vld [vmem:[%s624_s0] sm:$0xff] }
   0x3   :  { %v417_v6 = vpack.c.bf16 %v34_v4, %v33_v2  ;;  %389 = vmatprep.mubr.msk.f32.mxu0 %vm36_vm0, %v15_v5  ;;  %v23_v7 = vld [vmem:[%s624_s0 + $0x40] sm:$0xff] }
   0x4   :  { %414 = vmatprep.subr.bf16.mxu0 %v413_v3  ;;  %421 = vmatprep.subr.bf16.mxu1 %v413_v3  ;;  %v35_v8 = vld [vmem:[%s625_s1 + $0x20] sm:$0xf] }
   0x5   :  { %416 = vmatpush3.bf16.msra.mxu0 %v413_v3  ;;  %424 = vmatpush3.bf16.msra.mxu1 %v413_v3 }
   0x6   :  { %418 = vmatprep.subr.bf16.mxu0 %v417_v6  ;;  %422 = vmatprep.subr.bf16.mxu1 %v417_v6 }
   0x7   :  { %401 = vmatprep.mubr.msk.f32.mxu1 %vm36_vm0, %v23_v7 }
   0x8   :  { %10 = vsyncpa [#allocation5], 0  ;;  %v16_v9 = vld [vmem:[%s624_s0 + $0x8] sm:$0xff]  ;;  %v17_v11 = vld [vmem:[%s624_s0 + $0x10] sm:$0xff] }
   0x9   :  { %420 = vmatpush3.bf16.msra.mxu0 %v417_v6  ;;  %425 = vmatpush3.bf16.msra.mxu1 %v417_v6  ;;  %v24_v10 = vld [vmem:[%s624_s0 + $0x48] sm:$0xff]  ;;  %v25_v12 = vld [vmem:[%s624_s0 + $0x50] sm:$0xff]  ;;  %v18_v13 = vld [vmem:[%s624_s0 + $0x18] sm:$0xff] }
   0xa   :  { %387 = vmatprep.subr.msk.mxu0 %vm85_vm1, %v35_v8  ;;  %423 = vmatprep.subr.msk.mxu1 %vm85_vm1, %v35_v8  ;;  %v26_v14 = vld [vmem:[%s624_s0 + $0x58] sm:$0xff]  ;;  %v19_v15 = vld [vmem:[%s624_s0 + $0x20] sm:$0xff]  ;;  %v20_v17 = vld [vmem:[%s624_s0 + $0x28] sm:$0xff] }
   0xb   :  { %v27_v16 = vld [vmem:[%s624_s0 + $0x60] sm:$0xff]  ;;  %v28_v18 = vld [vmem:[%s624_s0 + $0x68] sm:$0xff]  ;;  %v21_v19 = vld [vmem:[%s624_s0 + $0x30] sm:$0xff] }
   0xc   :  { %v29_v20 = vld [vmem:[%s624_s0 + $0x70] sm:$0xff]  ;;  %v22_v21 = vld [vmem:[%s624_s0 + $0x38] sm:$0xff] }
   0xd   :  { %388 = vmatpush3.msk.msra.mxu0 %vm85_vm1, %v35_v8  ;;  %426 = vmatpush3.msk.msra.mxu1 %vm85_vm1, %v35_v8  ;;  %v30_v22 = vld [vmem:[%s624_s0 + $0x78] sm:$0xff]  ;;  %s479_s0 = smov [#allocation2]  }
   0xe   :  { %390 = vmatmul.mubr.msk.f32.vlgmr.msra.gmra.mrb[0].mxu0 %vm36_vm0, %v16_v9  ;;  %402 = vmatmul.mubr.msk.f32.vlgmr.msra.gmra.mrb[0].mxu1 %vm36_vm0, %v24_v10  ;;  %s316_s26 = sshll.u32 %s479_s0, 4  ;;  %s317_s26 = int_to_ptr.vmem [resolvable:$true] %s316_s26 }
   0xf   :  { %392 = vmatprep.mubr.msk.f32.mxu0 %vm36_vm0, %v17_v11  ;;  %404 = vmatprep.mubr.msk.f32.mxu1 %vm36_vm0, %v25_v12  ;;  %s431_s27 = scalar_lea.vmem %s317_s26, 2048  ;;  %p436_p1 = scmp.lt.s32.totalorder %s317_s26, %s317_s26 }
  0x10   :  { %p432_p0 = scmp.ne.s32.totalorder %s317_s26, %s431_s27  ;;  %p437_p2 = scmp.lt.s32.totalorder %s431_s27, %s431_s27 }
  0x12   :  { %393 = vmatmul.mubr.msk.f32.gmra.mrb[2].mxu0 %vm36_vm0, %v18_v13  ;;  %405 = vmatmul.mubr.msk.f32.gmra.mrb[2].mxu1 %vm36_vm0, %v26_v14  ;;  %p438_p3 = por %p437_p2, %p436_p1 }
  0x13   :  { %395 = vmatprep.mubr.msk.f32.mxu0 %vm36_vm0, %v19_v15  ;;  %407 = vmatprep.mubr.msk.f32.mxu1 %vm36_vm0, %v27_v16 }
  0x14   :  { %p439_p4 = pnand %p438_p3, %p432_p0 }
  0x16   :  { %396 = vmatmul.mubr.msk.f32.gmra.mrb[4].mxu0 %vm36_vm0, %v20_v17  ;;  %408 = vmatmul.mubr.msk.f32.gmra.mrb[4].mxu1 %vm36_vm0, %v28_v18 }
  0x17   :  { %398 = vmatprep.mubr.msk.f32.mxu0 %vm36_vm0, %v21_v19  ;;  %410 = vmatprep.mubr.msk.f32.mxu1 %vm36_vm0, %v29_v20 }
  0x1a   :  { %399 = vmatmul.mubr.msk.f32.gmra.mrb[6].mxu0 %vm36_vm0, %v22_v21  ;;  %411 = vmatmul.mubr.msk.f32.gmra.mrb[6].mxu1 %vm36_vm0, %v30_v22 }
  0xe1   :  { %v391_v23 = vpop.f32.mrb[0].mxu0  ;;  %v582_v24 = vpop.f32.mrb[0].mxu1 }
  0xe2   :  { %235 = vst [vmem:[#allocation2 + $0x8] sm:$0xff] %v391_v23  ;;  %v272_v25 = vmul.f32 %v391_v23, %v391_v23  ;;  %v155_v26 = vpop.f32.mrb[1].mxu0  ;;  %243 = vst [vmem:[#allocation2 + $0x48] sm:$0xff] %v582_v24  ;;  %v585_v27 = vpop.f32.mrb[1].mxu1 }
  0xe3   :  { %234 = vst [vmem:[#allocation2] sm:$0xff] %v155_v26  ;;  %v250_v28 = vadd.f32 %v391_v23, %v155_v26  ;;  %v271_v29 = vmul.f32 %v155_v26, %v155_v26  ;;  %242 = vst [vmem:[#allocation2 + $0x40] sm:$0xff] %v585_v27 }
  0xe5   :  { %v287_v30 = vadd.f32 %v272_v25, %v271_v29  ;;  %v394_v31 = vpop.f32.mrb[2].mxu0  ;;  %v588_v32 = vpop.f32.mrb[2].mxu1 }
  0xe6   :  { %237 = vst [vmem:[#allocation2 + $0x18] sm:$0xff] %v394_v31  ;;  %v165_v33 = vpop.f32.mrb[3].mxu0  ;;  %245 = vst [vmem:[#allocation2 + $0x58] sm:$0xff] %v588_v32  ;;  %v205_v34 = vpop.f32.mrb[3].mxu1  ;;  %v274_v37 = vmul.f32 %v394_v31, %v394_v31 }
  0xe7   :  { %236 = vst [vmem:[#allocation2 + $0x10] sm:$0xff] %v165_v33  ;;  %v251_v35 = vadd.f32 %v250_v28, %v165_v33  ;;  %v273_v36 = vmul.f32 %v165_v33, %v165_v33  ;;  %244 = vst [vmem:[#allocation2 + $0x50] sm:$0xff] %v205_v34 }
  0xe9   :  { %v288_v38 = vadd.f32 %v287_v30, %v273_v36  ;;  %v397_v39 = vpop.f32.mrb[4].mxu0  ;;  %v252_v40 = vadd.f32 %v394_v31, %v251_v35  ;;  %v409_v41 = vpop.f32.mrb[4].mxu1 }
  0xea   :  { %239 = vst [vmem:[#allocation2 + $0x28] sm:$0xff] %v397_v39  ;;  %v175_v42 = vpop.f32.mrb[5].mxu0  ;;  %247 = vst [vmem:[#allocation2 + $0x68] sm:$0xff] %v409_v41  ;;  %v215_v43 = vpop.f32.mrb[5].mxu1  ;;  %v276_v47 = vmul.f32 %v397_v39, %v397_v39 }
  0xeb   :  { %238 = vst [vmem:[#allocation2 + $0x20] sm:$0xff] %v175_v42  ;;  %v253_v44 = vadd.f32 %v252_v40, %v175_v42  ;;  %v275_v45 = vmul.f32 %v175_v42, %v175_v42  ;;  %v289_v46 = vadd.f32 %v288_v38, %v274_v37  ;;  %246 = vst [vmem:[#allocation2 + $0x60] sm:$0xff] %v215_v43 }
  0xed   :  { %v290_v48 = vadd.f32 %v289_v46, %v275_v45  ;;  %v400_v49 = vpop.f32.mrb[6].mxu0  ;;  %v254_v50 = vadd.f32 %v397_v39, %v253_v44  ;;  %v412_v51 = vpop.f32.mrb[6].mxu1 }
  0xee   :  { %241 = vst [vmem:[#allocation2 + $0x38] sm:$0xff] %v400_v49  ;;  %v185_v52 = vpop.f32.mrb[7].mxu0  ;;  %249 = vst [vmem:[#allocation2 + $0x78] sm:$0xff] %v412_v51  ;;  %v225_v53 = vpop.f32.mrb[7].mxu1 }
  0xef   :  { %240 = vst [vmem:[#allocation2 + $0x30] sm:$0xff] %v185_v52  ;;  %v255_v54 = vadd.f32 %v254_v50, %v185_v52  ;;  %v277_v55 = vmul.f32 %v185_v52, %v185_v52  ;;  %v291_v56 = vadd.f32 %v290_v48, %v276_v47  ;;  %248 = vst [vmem:[#allocation2 + $0x70] sm:$0xff] %v225_v53 }
  0xf0   :  { %442 = shalt.err (!%p439_p4)
}
  0xf1   :  { %s443_s30 = scalar_lea.hbm %s626_s2, 2048 }
  0xf2   :  { %p444_p5 = scmp.ne.s32.totalorder %s626_s2, %s443_s30  ;;  %p447_p6 = scmp.lt.u32.totalorder %s443_s30, %s626_s2 }
  0xf4   :  { %p449_p7 = pnand %p447_p6, %p444_p5 }
  0xf6   :  { %452 = shalt.err (!%p449_p7)
}
  0xf7   :  { %s480_s7 = smov 128   ;;  %s481_s8 = smov 8   ;;  %v278_v57 = vmul.f32 %v400_v49, %v400_v49  ;;  %v256_v58 = vadd.f32 %v400_v49, %v255_v54  ;;  %v292_v59 = vadd.f32 %v291_v56, %v277_v55  ;;  %v279_v60 = vmul.f32 %v585_v27, %v585_v27 }
  0xf8   :  { %322 = dma.vmem_to_hbm [thread:$0]  %s317_s26, 2048, %s626_s2, [#allocation3], %s480_s7, %s480_s7, %s481_s8   ;;  %v280_v63 = vmul.f32 %v582_v24, %v582_v24  ;;  %v281_v2 = vmul.f32 %v205_v34, %v205_v34  ;;  %v282_v5 = vmul.f32 %v588_v32, %v588_v32  ;;  %v283_v8 = vmul.f32 %v215_v43, %v215_v43 }
  0xf9   :  { %v293_v61 = vadd.f32 %v292_v59, %v278_v57  ;;  %v257_v62 = vadd.f32 %v256_v58, %v585_v27  ;;  %v284_v11 = vmul.f32 %v409_v41, %v409_v41  ;;  %v285_v14 = vmul.f32 %v225_v53, %v225_v53  ;;  %s482_s2 = smov [#allocation4]  }
  0xfa   :  { %v286_v17 = vmul.f32 %v412_v51, %v412_v51  ;;  %s329_s11 = sshll.u32 %s482_s2, 4  ;;  %vm308_vm2 = vcmask 1040384   ;;  %s330_s11 = int_to_ptr.vmem [resolvable:$true] %s329_s11 }
  0xfb   :  { %v294_v0 = vadd.f32 %v293_v61, %v279_v60  ;;  %v258_v1 = vadd.f32 %v582_v24, %v257_v62  ;;  %s453_s12 = scalar_lea.vmem %s330_s11, 32  ;;  %p458_p9 = scmp.lt.s32.totalorder %s330_s11, %s330_s11 }
  0xfc   :  { %p454_p8 = scmp.ne.s32.totalorder %s330_s11, %s453_s12  ;;  %p459_p10 = scmp.lt.s32.totalorder %s453_s12, %s453_s12 }
  0xfd   :  { %v259_v3 = vadd.f32 %v258_v1, %v205_v34  ;;  %v295_v4 = vadd.f32 %v294_v0, %v280_v63 }
  0xfe   :  { %p460_p11 = por %p459_p10, %p458_p9 }
  0xff   :  { %v296_v6 = vadd.f32 %v295_v4, %v281_v2  ;;  %v260_v7 = vadd.f32 %v588_v32, %v259_v3 }
 0x100   :  { %p461_p12 = pnand %p460_p11, %p454_p8 }
 0x101   :  { %v261_v9 = vadd.f32 %v260_v7, %v215_v43  ;;  %v297_v10 = vadd.f32 %v296_v6, %v282_v5 }
 0x103   :  { %v298_v12 = vadd.f32 %v297_v10, %v283_v8  ;;  %v262_v13 = vadd.f32 %v409_v41, %v261_v9 }
 0x105   :  { %v263_v15 = vadd.f32 %v262_v13, %v225_v53  ;;  %v299_v16 = vadd.f32 %v298_v12, %v284_v11 }
 0x107   :  { %v264_v18 = vadd.f32 %v412_v51, %v263_v15  ;;  %v300_v19 = vadd.f32 %v299_v16, %v285_v14 }
 0x109   :  { %v265_v20 = vrot.slane %v264_v18, 4  ;;  %v301_v21 = vadd.f32 %v300_v19, %v286_v17 }
 0x10b   :  { %v266_v22 = vadd.f32 %v265_v20, %v264_v18  ;;  %v302_v23 = vrot.slane %v301_v21, 4 }
 0x10d   :  { %v267_v24 = vrot.slane %v266_v22, 2  ;;  %v303_v25 = vadd.f32 %v302_v23, %v301_v21 }
 0x10f   :  { %v268_v26 = vadd.f32 %v267_v24, %v266_v22  ;;  %v304_v27 = vrot.slane %v303_v25, 2 }
 0x111   :  { %v269_v28 = vrot.slane %v268_v26, 1  ;;  %v305_v29 = vadd.f32 %v304_v27, %v303_v25 }
 0x113   :  { %v306_v30 = vrot.slane %v305_v29, 1  ;;  %v270_v31 = vadd.f32 %v269_v28, %v268_v26 }
 0x115   :  { %v307_v32 = vadd.f32 %v306_v30, %v305_v29 }
 0x117   :  { %v309_v33 = vsel %vm308_vm2, %v270_v31, %v307_v32 }
 0x118   :  { %310 = vst [vmem:[#allocation4] sm:$0x3] %v309_v33 }
 0x119   :  { %464 = shalt.err (!%p461_p12)
}
 0x11a   :  { %s465_s15 = scalar_lea.hbm %s627_s3, 32 }
 0x11b   :  { %p466_p13 = scmp.ne.s32.totalorder %s627_s3, %s465_s15  ;;  %p469_p0 = scmp.lt.u32.totalorder %s465_s15, %s627_s3 }
 0x11d   :  { %p471_p1 = pnand %p469_p0, %p466_p13 }
 0x11f   :  { %474 = shalt.err (!%p471_p1)
}
 0x120   :  { %332 = dma.vmem_to_hbm [thread:$0]  %s330_s11, 32, %s627_s3, [#allocation5]  }
 0x121   :  { %475 = dma.done.wait [#allocation3], 2048  }
 0x122   :  { %476 = vsyncadd [#allocation3], 4294965248 }
 0x123   :  { %477 = dma.done.wait [#allocation5], 32  }
 0x124   :  { %478 = vsyncadd [#allocation5], 4294967264 }
 0x125   :  { %339 = vsyncpa [#allocation3], 1 }
 0x126   :  { %340 = vsyncpa [#allocation5], 1 }

</bundles_post_ra>
